<compile_context>
chip_gen: v6e
topology: v6e:2x2x1
jax: 0.10.0
libtpu: 0.0.40
codegen_flags: <defaults>
</compile_context>

<pallas_src>
import functools
import math

import jax
import jax.numpy as jnp
from jax.experimental import pallas as pl
from jax.experimental.pallas import tpu as pltpu


def _round_up(x, m):
    return (x + m - 1) // m * m


def _vmem_capacity_bytes():
    """Physical VMEM per TensorCore; fall back to the v7x 64 MiB floor."""
    try:
        return int(pltpu.get_tpu_info().vmem_capacity_bytes)
    except Exception:
        return 64 * 1024 * 1024


def _pick_tile(npad, cap_rows):
    """Largest of {1024,...,32} rows that divides npad and fits cap_rows."""
    for cand in (1024, 512, 256, 128, 64, 32):
        if cand <= cap_rows and cand <= npad and npad % cand == 0:
            return cand
    return 32


def _derive_tiles(n_nodes, heads, fout, hf, max_tile_m=None):
    """Generation-aware row-tile sizing for Kernel B.

    The int8 adj row tile dominates HBM traffic and VMEM; size it against ~75%
    of physical VMEM after reserving the resident e-factor / RHS blocks, the
    f32 elementwise working set (~5 copies of the (TM, Npad) tile) and the
    double-buffered output tile.
    """
    npad = _round_up(max(n_nodes, 128), 128)
    vmem_cap = _vmem_capacity_bytes()
    budget = max(int(vmem_cap * 0.75), 16 * 1024 * 1024)

    rhs_lanes = _round_up(heads * (fout + 1), 128)
    out_lanes = _round_up(hf, 128)
    # Resident (constant-index) inputs: e-factor columns (f32) + aggregation RHS
    # (bf16); x2 pipeline buffers, +1 for the in-kernel value copy of the RHS.
    resident = 2 * (2 * heads) * npad * 4 + 3 * npad * rhs_lanes * 2
    # Per-row-of-tile bytes: up to 3 int8 adj buffers, ~5 f32 (TM, Npad)
    # temporaries, double-buffered f32 output tile, tiny e-factor row tile.
    per_row = 3 * npad + 5 * npad * 4 + 2 * out_lanes * 4 + 2 * (2 * heads) * 4
    tm_fit = max((budget - resident) // per_row, 32)
    cap = tm_fit if max_tile_m is None else min(tm_fit, max_tile_m)
    tile_m = _pick_tile(npad, min(cap, 1024))
    tile_a = _pick_tile(npad, 1024)   # Kernel A is O(N*Fin*HF): tile big & cheap.
    return npad, tile_m, tile_a, budget


# --------------------- Kernel A: fused per-node projection ---------------------
def _proj_kernel(x_ref, wcat_ref, wscore_ref, h_ref, e_ref, *, heads, slope):
    x = x_ref[...]                                            # (TA, Fin) f32
    # h for ALL heads in one wide matmul; bf16 MXU operands, f32 accumulation.
    h = jnp.dot(x.astype(jnp.bfloat16), wcat_ref[...],
                preferred_element_type=jnp.float32)           # (TA, heads*Fout)
    h_ref[...] = h.astype(h_ref.dtype)
    # Per-node attention scores f1|f2 = x @ (W^T a1 | W^T a2), kept f32.
    sc = jnp.dot(x, wscore_ref[...],
                 preferred_element_type=jnp.float32)          # (TA, 2*heads)
    # Clamp scores so the factored exponentials stay finite f32 (no inf*0 NaN
    # in Kernel B); exp(+-60) and their pairwise products never produce NaN,
    # and the min(.,5) / underflow-to-0 endpoints match the fused exp result.
    sc = jnp.clip(sc, -60.0, 60.0)
    f1 = sc[:, :heads]
    f2 = sc[:, heads:]
    # O(N*heads) transcendentals total — the N^2 path in Kernel B has none.
    e_ref[...] = jnp.concatenate(
        [jnp.exp(-f1), jnp.exp(-slope * f1),
         jnp.exp(-f2), jnp.exp(-slope * f2)], axis=1)         # (TA, 4*heads)


# ----------------- Kernel B: masked attention + fused aggregation --------------
def _gat_attn_kernel(erow_ref, ecol_ref, adj_ref, haug_ref, o_ref, *, heads, fout):
    erow = erow_ref[...]                          # (TM, 2*heads)  [e1 | e1s]
    ecol = ecol_ref[...]                          # (2*heads, Npad) [e2 ; e2s]
    adjf = adj_ref[...].astype(jnp.float32)       # (TM, Npad) edge multiplicity
    haug = haug_ref[...]                          # (Npad, heads*(Fout+1)) bf16

    for h in range(heads):                        # static unroll over heads
        # pos = exp(-(f1_i+f2_j)), neg = exp(-slope*(f1_i+f2_j));
        # (pos < 1) <=> (s > 0), so this reproduces exp(-leaky_relu(s)).
        pos = erow[:, h:h + 1] * ecol[h:h + 1, :]                     # (TM, Npad)
        neg = erow[:, heads + h:heads + h + 1] * ecol[heads + h:heads + h + 1, :]
        alpha = jnp.minimum(jnp.where(pos < 1.0, pos, neg), 5.0)
        att = (alpha * adjf).astype(jnp.bfloat16)                     # masked attn

        # One MXU matmul against the full lane-dense RHS (<=128 output lanes:
        # same pass count as a 9-wide RHS); rowsum fused via the ones column.
        agg = jnp.dot(att, haug, preferred_element_type=jnp.float32)  # (TM, RHS_W)
        base = h * (fout + 1)
        num = agg[:, base:base + fout]
        rowsum = agg[:, base + fout:base + fout + 1]
        rowsum = jnp.where(rowsum > 0, rowsum, 1e-8)
        hp = num / rowsum
        # ELU; clamp expm1 argument so the unselected branch never produces inf.
        hp = jnp.where(hp > 0, hp, jnp.expm1(jnp.minimum(hp, 0.0)))
        # Static lane-slice store into the output tile (no concatenate relayout).
        o_ref[:, h * fout:(h + 1) * fout] = hp.astype(o_ref.dtype)


def gat_layer(x, edge_index, W_all, a_all, *, slope=0.2, max_tile_m=None):
    """Forward of the GAT attention layer (get_att=False, add_self_loop=False).

    x:          (N, F_in) float32
    edge_index: (E, 2) int32, rows [src, dst]
    W_all:      (heads, F_out, F_in)
    a_all:      (heads, 2*F_out, 1)
    returns:    (N, heads * F_out)
    """
    N, Fin = x.shape
    heads, Fout, _ = W_all.shape
    HF = heads * Fout
    RHS_W = heads * (Fout + 1)

    Npad, tile_m, tile_a, vmem_budget = _derive_tiles(N, heads, Fout, HF, max_tile_m)
    n_tiles_b = Npad // tile_m
    n_tiles_a = Npad // tile_a

    # ---- plain-JAX glue: pad, densify edge list, fold attention vectors ----
    xp = jnp.zeros((Npad, Fin), jnp.float32).at[:N].set(x.astype(jnp.float32))
    # adj[i, j] = multiplicity of edge (i, j); duplicates SUM (sparse-COO
    # coalescing). Scatter-added straight into int8 (exact up to 127, no dense
    # f32 intermediate) — 1 byte/entry of HBM streaming in Kernel B.
    adj = jnp.zeros((Npad, Npad), jnp.int8).at[
        edge_index[:, 0], edge_index[:, 1]].add(jnp.int8(1))

    a1 = a_all[:, :Fout, 0]                                    # (heads, Fout)
    a2 = a_all[:, Fout:, 0]                                    # (heads, Fout)
    Wcat = jnp.transpose(W_all, (2, 0, 1)).reshape(Fin, HF)    # (Fin, heads*Fout)
    WA1 = jnp.einsum('hof,ho->fh', W_all, a1)                  # (Fin, heads)
    WA2 = jnp.einsum('hof,ho->fh', W_all, a2)                  # (Fin, heads)
    Wscore = jnp.concatenate([WA1, WA2], axis=1)               # (Fin, 2*heads)

    cparams = pltpu.CompilerParams(
        dimension_semantics=("parallel",),        # row tiles shard across TCs (v7x)
        vmem_limit_bytes=vmem_budget)             # ~75% of physical VMEM per core

    # --------------------------- Kernel A call ------------------------------
    h_all, efac = pl.pallas_call(
        functools.partial(_proj_kernel, heads=heads, slope=slope),
        out_shape=(jax.ShapeDtypeStruct((Npad, HF), jnp.bfloat16),
                   jax.ShapeDtypeStruct((Npad, 4 * heads), jnp.float32)),
        grid_spec=pltpu.PrefetchScalarGridSpec(
            num_scalar_prefetch=0,
            grid=(n_tiles_a,),
            in_specs=[
                pl.BlockSpec((tile_a, Fin), lambda i: (i, 0)),        # x row tile
                pl.BlockSpec((Fin, HF), lambda i: (0, 0)),            # Wcat (bf16)
                pl.BlockSpec((Fin, 2 * heads), lambda i: (0, 0)),     # Wscore (f32)
            ],
            out_specs=[pl.BlockSpec((tile_a, HF), lambda i: (i, 0)),
                       pl.BlockSpec((tile_a, 4 * heads), lambda i: (i, 0))],
        ),
        compiler_params=cparams,
        cost_estimate=pl.CostEstimate(
            flops=2 * Npad * Fin * (HF + 2 * heads),
            transcendentals=4 * heads * Npad,
            bytes_accessed=(xp.size * 4 + Wcat.size * 2 + Wscore.size * 4
                            + Npad * HF * 2 + Npad * 4 * heads * 4)),
    )(xp, Wcat.astype(jnp.bfloat16), Wscore)

    # Layout plumbing for Kernel B (O(N*HF), cheap vs the O(N^2) adjacency).
    erow = efac[:, :2 * heads]                                 # (Npad, 2*heads)
    ecol = jnp.transpose(efac[:, 2 * heads:])                  # (2*heads, Npad)
    # Lane-dense aggregation RHS: per head [h | 1] columns, bf16.
    haug = jnp.concatenate(
        [h_all.reshape(Npad, heads, Fout),
         jnp.ones((Npad, heads, 1), jnp.bfloat16)], axis=2).reshape(Npad, RHS_W)

    adj_spec = pl.BlockSpec((tile_m, Npad), lambda i: (i, 0))
    if n_tiles_b >= 3:
        try:  # deepen the adj DMA pipeline when the grid is long enough
            adj_spec = pl.BlockSpec((tile_m, Npad), lambda i: (i, 0),
                                    pipeline_mode=pl.Buffered(3))
        except Exception:
            pass

    # --------------------------- Kernel B call ------------------------------
    out = pl.pallas_call(
        functools.partial(_gat_attn_kernel, heads=heads, fout=Fout),
        out_shape=jax.ShapeDtypeStruct((Npad, HF), jnp.float32),
        grid_spec=pltpu.PrefetchScalarGridSpec(
            num_scalar_prefetch=0,
            grid=(n_tiles_b,),
            in_specs=[
                pl.BlockSpec((tile_m, 2 * heads), lambda i: (i, 0)),  # e1|e1s rows
                pl.BlockSpec((2 * heads, Npad), lambda i: (0, 0)),    # e2|e2s resident
                adj_spec,                                             # int8 adj tile
                pl.BlockSpec((Npad, RHS_W), lambda i: (0, 0)),        # h_aug resident
            ],
            out_specs=pl.BlockSpec((tile_m, HF), lambda i: (i, 0)),
        ),
        compiler_params=cparams,
        cost_estimate=pl.CostEstimate(
            flops=2 * heads * Npad * Npad * RHS_W,
            transcendentals=0,
            bytes_accessed=(adj.size + erow.size * 4 + ecol.size * 4
                            + haug.size * 2 + Npad * HF * 4)),
    )(erow, ecol, adj, haug)

    return out[:N]


def gat_reference(x, edge_index, W_all, a_all, slope=0.2):
    """Pure-JAX reference mirroring the PyTorch edge-list computation (f32)."""
    N = x.shape[0]
    heads, Fout, _ = W_all.shape
    src, dst = edge_index[:, 0], edge_index[:, 1]
    outs = []
    for k in range(heads):
        W, a = W_all[k], a_all[k][:, 0]
        h = x @ W.T
        feat = jnp.concatenate([h[src], h[dst]], axis=1)
        s = feat @ a
        lr = jnp.where(s > 0, s, slope * s)
        alpha = jnp.clip(jnp.exp(-lr), -5.0, 5.0)
        rowsum = jnp.zeros((N,), jnp.float32).at[src].add(alpha)
        rowsum = jnp.where(rowsum > 0, rowsum, 1e-8)
        hp = jnp.zeros((N, Fout), jnp.float32).at[src].add(alpha[:, None] * h[dst])
        hp = hp / rowsum[:, None]
        hp = jnp.where(hp > 0, hp, jnp.exp(hp) - 1.0)
        outs.append(hp)
    return jnp.concatenate(outs, axis=1)


def _xavier_uniform(key, shape, gain):
    # PyTorch convention for 2D: fan_out = shape[0], fan_in = shape[1].
    fan_out, fan_in = shape[0], shape[1]
    bound = gain * math.sqrt(6.0 / (fan_in + fan_out))
    return jax.random.uniform(key, shape, jnp.float32, -bound, bound)


if __name__ == "__main__":
    # DSCom_pyg config: hidden1 = 8, in_head = 8; small node count for the demo.
    N, F_IN, F_OUT, HEADS = 64, 16, 8, 8
    SLOPE = 0.2
    GAIN = 1.414

    key = jax.random.PRNGKey(0)
    kx, kadj, *kparams = jax.random.split(key, 2 + 2 * HEADS)

    x = jax.random.normal(kx, (N, F_IN), jnp.float32)

    # Random sparse graph -> edge_index (E, 2); unique edges by construction.
    adj_mask = jax.random.bernoulli(kadj, p=0.3, shape=(N, N))
    rows, cols = jnp.nonzero(adj_mask)
    edge_index = jnp.stack([rows, cols], axis=1).astype(jnp.int32)

    # Deterministic per-head parameters (xavier_uniform, gain=1.414).
    W_all = jnp.stack([
        _xavier_uniform(kparams[2 * i], (F_OUT, F_IN), GAIN) for i in range(HEADS)
    ])                                                          # (heads, Fout, Fin)
    a_all = jnp.stack([
        _xavier_uniform(kparams[2 * i + 1], (2 * F_OUT, 1), GAIN) for i in range(HEADS)
    ])                                                          # (heads, 2*Fout, 1)

    # max_tile_m=64 only so the tiny demo still exercises the multi-tile adj
    # pipeline and node padding (N=64 -> Npad=128, 2 tiles); production graphs
    # use the VMEM-derived tile (>=256 rows) automatically.
    out = gat_layer(x, edge_index, W_all, a_all, slope=SLOPE, max_tile_m=64)
    out = jax.block_until_ready(out)

    ref = gat_reference(x, edge_index, W_all, a_all, slope=SLOPE)
    assert out.shape == (N, HEADS * F_OUT)
    assert not bool(jnp.isnan(out).any())
    err = float(jnp.max(jnp.abs(out - ref)))
    assert bool(jnp.allclose(out, ref, atol=1e-2, rtol=1e-2)), err

    print("KERNEL_OK")
</pallas_src>

<mosaic_0001>
module attributes {stable_mosaic.version = 11 : i64} {
  func.func @_proj_kernel(%arg0: i32, %arg1: memref<128x16xf32, #tpu.memory_space<vmem>>, %arg2: memref<16x64xbf16, #tpu.memory_space<vmem>>, %arg3: memref<16x16xf32, #tpu.memory_space<vmem>>, %arg4: memref<128x64xbf16, #tpu.memory_space<vmem>>, %arg5: memref<128x32xf32, #tpu.memory_space<vmem>>) attributes {dimension_semantics = [#tpu.dimension_semantics<parallel>], iteration_bounds = array<i64: 1>, scalar_prefetch = 0 : i64, scratch_operands = 0 : i64, tpu.core_type = #tpu.core_type<tc>, window_params = [{transform_indices = @transform_0, window_bounds = array<i64: 128, 16>}, {pipeline_mode = #tpu.pipeline_mode<synchronous>, transform_indices = @transform_1, window_bounds = array<i64: 16, 64>}, {pipeline_mode = #tpu.pipeline_mode<synchronous>, transform_indices = @transform_2, window_bounds = array<i64: 16, 16>}, {transform_indices = @transform_3, window_bounds = array<i64: 128, 64>}, {transform_indices = @transform_4, window_bounds = array<i64: 128, 32>}]} {
    %c0 = arith.constant 0 : index
    %c0_0 = arith.constant 0 : index
    %0 = vector.load %arg1[%c0, %c0_0] : memref<128x16xf32, #tpu.memory_space<vmem>>, vector<128x16xf32>
    %1 = arith.truncf %0 : vector<128x16xf32> to vector<128x16xbf16>
    %c0_1 = arith.constant 0 : index
    %c0_2 = arith.constant 0 : index
    %2 = vector.load %arg2[%c0_1, %c0_2] : memref<16x64xbf16, #tpu.memory_space<vmem>>, vector<16x64xbf16>
    %cst = arith.constant dense<0.000000e+00> : vector<128x64xf32>
    %3 = tpu.matmul %1, %2, %cst {dimension_numbers = #tpu.dot_dimension_numbers<[1], [0], [0], [1], [0, 0, 1, 1], [], []>} : vector<128x16xbf16>, vector<16x64xbf16>, vector<128x64xf32> -> vector<128x64xf32>
    %4 = arith.truncf %3 : vector<128x64xf32> to vector<128x64xbf16>
    %c0_3 = arith.constant 0 : index
    %c0_4 = arith.constant 0 : index
    %5 = vector.load %arg4[%c0_3, %c0_4] : memref<128x64xbf16, #tpu.memory_space<vmem>>, vector<128x64xbf16>
    tpu.vector_store %arg4[%c0_3, %c0_4], %4 {strides = array<i32>} : memref<128x64xbf16, #tpu.memory_space<vmem>>, vector<128x64xbf16>,
    %c0_5 = arith.constant 0 : index
    %c0_6 = arith.constant 0 : index
    %6 = vector.load %arg3[%c0_5, %c0_6] : memref<16x16xf32, #tpu.memory_space<vmem>>, vector<16x16xf32>
    %cst_7 = arith.constant dense<0.000000e+00> : vector<128x16xf32>
    %7 = tpu.matmul %0, %6, %cst_7 {dimension_numbers = #tpu.dot_dimension_numbers<[1], [0], [0], [1], [0, 0, 1, 1], [], []>} : vector<128x16xf32>, vector<16x16xf32>, vector<128x16xf32> -> vector<128x16xf32>
    %cst_8 = arith.constant -6.000000e+01 : f32
    %cst_9 = arith.constant 6.000000e+01 : f32
    %8 = vector.broadcast %cst_8 : f32 to vector<128x16xf32>
    %9 = arith.maximumf %8, %7 : vector<128x16xf32>
    %10 = vector.broadcast %cst_9 : f32 to vector<128x16xf32>
    %11 = arith.minimumf %10, %9 : vector<128x16xf32>
    %12 = vector.extract_strided_slice %11 {offsets = [0, 0], sizes = [128, 8], strides = [1, 1]} : vector<128x16xf32> to vector<128x8xf32>
    %13 = vector.extract_strided_slice %11 {offsets = [0, 8], sizes = [128, 8], strides = [1, 1]} : vector<128x16xf32> to vector<128x8xf32>
    %cst_10 = arith.constant 0.000000e+00 : f32
    %14 = vector.broadcast %cst_10 : f32 to vector<128x8xf32>
    %15 = arith.subf %14, %12 : vector<128x8xf32>
    %16 = math.exp %15 : vector<128x8xf32>
    %cst_11 = arith.constant -2.000000e-01 : f32
    %17 = vector.broadcast %cst_11 : f32 to vector<128x8xf32>
    %18 = arith.mulf %17, %12 : vector<128x8xf32>
    %19 = math.exp %18 : vector<128x8xf32>
    %cst_12 = arith.constant 0.000000e+00 : f32
    %20 = vector.broadcast %cst_12 : f32 to vector<128x8xf32>
    %21 = arith.subf %20, %13 : vector<128x8xf32>
    %22 = math.exp %21 : vector<128x8xf32>
    %cst_13 = arith.constant -2.000000e-01 : f32
    %23 = vector.broadcast %cst_13 : f32 to vector<128x8xf32>
    %24 = arith.mulf %23, %13 : vector<128x8xf32>
    %25 = math.exp %24 : vector<128x8xf32>
    %26 = tpu.concatenate %16, %19, %22, %25 in 1 : vector<128x8xf32>, vector<128x8xf32>, vector<128x8xf32>, vector<128x8xf32> -> vector<128x32xf32>
    %c0_14 = arith.constant 0 : index
    %c0_15 = arith.constant 0 : index
    %27 = vector.load %arg5[%c0_14, %c0_15] : memref<128x32xf32, #tpu.memory_space<vmem>>, vector<128x32xf32>
    tpu.vector_store %arg5[%c0_14, %c0_15], %26 {strides = array<i32>} : memref<128x32xf32, #tpu.memory_space<vmem>>, vector<128x32xf32>,
    return
  }
  func.func @transform_0(%arg0: i32) -> (i32, i32) {
    %c0_i32 = arith.constant 0 : i32
    %c0_i32_0 = arith.constant 0 : i32
    return %arg0, %c0_i32 : i32, i32
  }
  func.func @transform_1(%arg0: i32) -> (i32, i32) {
    %c0_i32 = arith.constant 0 : i32
    %c0_i32_0 = arith.constant 0 : i32
    %c0_i32_1 = arith.constant 0 : i32
    return %c0_i32, %c0_i32_0 : i32, i32
  }
  func.func @transform_2(%arg0: i32) -> (i32, i32) {
    %c0_i32 = arith.constant 0 : i32
    %c0_i32_0 = arith.constant 0 : i32
    %c0_i32_1 = arith.constant 0 : i32
    return %c0_i32, %c0_i32_0 : i32, i32
  }
  func.func @transform_3(%arg0: i32) -> (i32, i32) {
    %c0_i32 = arith.constant 0 : i32
    %c0_i32_0 = arith.constant 0 : i32
    return %arg0, %c0_i32 : i32, i32
  }
  func.func @transform_4(%arg0: i32) -> (i32, i32) {
    %c0_i32 = arith.constant 0 : i32
    %c0_i32_0 = arith.constant 0 : i32
    return %arg0, %c0_i32 : i32, i32
  }
}

</mosaic_0001>

<bundles_post_ra>
// kernel: tpu_custom_call.1
= control target key start
LH: loop header
LB: loop body
LE: loop exit
PB: predicated region body
PF: predicated region fallthrough
CT: control target
= control target key end

     0   :  { %vm49_vm0 = vcmask 130048   ;;  %vm235_vm1 = vcmask 519168   ;;  %vm751_vm2 = vcmask 64512   ;;  %vm784_vm3 = vcmask 195584   ;;  %s1435_s2 = inlined_call_operand.vmem [shape: f32[16,16], index: 2, kind: input, shape index: {}]   ;;  %s1436_s0 = inlined_call_operand.vmem [shape: f32[128,16], index: 0, kind: input, shape index: {}]   ;;  %s1437_s1 = inlined_call_operand.vmem [shape: bf16[16,64], index: 1, kind: input, shape index: {}]   ;;  %s1438_s3 = inlined_call_operand.vmem [shape: bf16[128,64], index: 3, kind: output, shape index: {0}]   ;;  %s1439_s4 = inlined_call_operand.vmem [shape: f32[128,32], index: 4, kind: output, shape index: {1}]  }
   0x1   :  { %v253_v0 = vld [vmem:[%s1435_s2 + $0x8] sm:$0xff]  ;;  %v252_v1 = vld [vmem:[%s1435_s2] sm:$0xff]  ;;  %v19_v5 = vld [vmem:[%s1436_s0 + $0x10] sm:$0xff]  ;;  %s1040_s2 = smov 16   ;;  %vm801_vm4 = vcmask 261120  }
   0x2   :  { %v17_v2 = vld [vmem:[%s1436_s0] sm:$0xff]  ;;  %944 = vmatprep.subr.mxu1 %v253_v0  ;;  %v18_v3 = vld [vmem:[%s1436_s0 + $0x8] sm:$0xff]  ;;  %v20_v6 = vld [vmem:[%s1436_s0 + $0x18] sm:$0xff] }
   0x3   :  { %948 = vmatprep.mubr.msk.f32.mxu1 %vm49_vm0, %v17_v2  ;;  %945 = vmatpush3.msra.mxu1 %v253_v0  ;;  %v33_v4 = vpack.c.bf16 %v18_v3, %v17_v2  ;;  %v974_v7 = vld [vmem:[%s1437_s1] sm:$0xff]   ;;  %v34_v9 = vpack.c.bf16 %v20_v6, %v19_v5  ;;  %v22_v10 = vld [vmem:[%s1436_s0 + $0x28] sm:$0xff]  ;;  %v23_v12 = vld [vmem:[%s1436_s0 + $0x30] sm:$0xff] }
   0x4   :  { %946 = vmatprep.subr.mxu1 %v252_v1  ;;  %v21_v8 = vld [vmem:[%s1436_s0 + $0x20] sm:$0xff]  ;;  %926 = vmatprep.subr.bf16.mxu0 %v974_v7  ;;  %v24_v13 = vld [vmem:[%s1436_s0 + $0x38] sm:$0xff]  ;;  %v26_v16 = vld [vmem:[%s1436_s0 + $0x48] sm:$0xff] }
   0x5   :  { %947 = vmatpush3.msra.mxu1 %v252_v1  ;;  %928 = vmatprep.mubr.msk.bf16.mxu0 %vm49_vm0, %v33_v4  ;;  %v35_v11 = vpack.c.bf16 %v22_v10, %v21_v8  ;;  %v25_v14 = vld [vmem:[%s1436_s0 + $0x40] sm:$0xff]  ;;  %v36_v15 = vpack.c.bf16 %v24_v13, %v23_v12  ;;  %v27_v18 = vld [vmem:[%s1436_s0 + $0x50] sm:$0xff]  ;;  %v28_v19 = vld [vmem:[%s1436_s0 + $0x58] sm:$0xff] }
   0x6   :  { %949 = vmatmul.mubr.msk.f32.vlgmr.msra.gmra.mxu1 %vm49_vm0, %v18_v3  ;;  %927 = vmatpush3.bf16.msra.mxu0 %v974_v7  ;;  %v37_v17 = vpack.c.bf16 %v26_v16, %v25_v14  ;;  %v29_v20 = vld [vmem:[%s1436_s0 + $0x60] sm:$0xff]  ;;  %v38_v21 = vpack.c.bf16 %v28_v19, %v27_v18  ;;  %v30_v22 = vld [vmem:[%s1436_s0 + $0x68] sm:$0xff]  ;;  %v31_v24 = vld [vmem:[%s1436_s0 + $0x70] sm:$0xff] }
   0x7   :  { %951 = vmatprep.mubr.msk.f32.mxu1 %vm49_vm0, %v19_v5  ;;  %v39_v23 = vpack.c.bf16 %v30_v22, %v29_v20  ;;  %v32_v25 = vld [vmem:[%s1436_s0 + $0x78] sm:$0xff]  ;;  %s1039_s0 = smov 8  }
   0x8   :  { %v40_v26 = vpack.c.bf16 %v32_v25, %v31_v24 }
   0x9   :  { %929 = vmatmul.mubr.msk.bf16.vlgmr.msra.gmra.mxu0 %vm49_vm0, %v34_v9 }
   0xa   :  { %952 = vmatmul.mubr.msk.f32.gmra.mxu1 %vm49_vm0, %v20_v6  ;;  %932 = vmatprep.mubr.msk.bf16.mxu0 %vm49_vm0, %v35_v11 }
   0xb   :  { %954 = vmatprep.mubr.msk.f32.mxu1 %vm49_vm0, %v21_v8 }
   0xe   :  { %955 = vmatmul.mubr.msk.f32.gmra.mxu1 %vm49_vm0, %v22_v10 }
   0xf   :  { %957 = vmatprep.mubr.msk.f32.mxu1 %vm49_vm0, %v23_v12 }
  0x11   :  { %933 = vmatmul.mubr.msk.bf16.gmra.mxu0 %vm49_vm0, %v36_v15 }
  0x12   :  { %958 = vmatmul.mubr.msk.f32.gmra.mxu1 %vm49_vm0, %v24_v13  ;;  %936 = vmatprep.mubr.msk.bf16.mxu0 %vm49_vm0, %v37_v17 }
  0x13   :  { %960 = vmatprep.mubr.msk.f32.mxu1 %vm49_vm0, %v25_v14 }
  0x16   :  { %961 = vmatmul.mubr.msk.f32.gmra.mxu1 %vm49_vm0, %v26_v16 }
  0x17   :  { %963 = vmatprep.mubr.msk.f32.mxu1 %vm49_vm0, %v27_v18 }
  0x19   :  { %937 = vmatmul.mubr.msk.bf16.gmra.mxu0 %vm49_vm0, %v38_v21 }
  0x1a   :  { %964 = vmatmul.mubr.msk.f32.gmra.mxu1 %vm49_vm0, %v28_v19  ;;  %940 = vmatprep.mubr.msk.bf16.mxu0 %vm49_vm0, %v39_v23 }
  0x1b   :  { %966 = vmatprep.mubr.msk.f32.mxu1 %vm49_vm0, %v29_v20 }
  0x1e   :  { %967 = vmatmul.mubr.msk.f32.gmra.mxu1 %vm49_vm0, %v30_v22 }
  0x1f   :  { %969 = vmatprep.mubr.msk.f32.mxu1 %vm49_vm0, %v31_v24 }
  0x21   :  { %941 = vmatmul.mubr.msk.bf16.gmra.mxu0 %vm49_vm0, %v40_v26 }
  0x22   :  { %970 = vmatmul.mubr.msk.f32.gmra.mxu1 %vm49_vm0, %v32_v25 }
  0xc6   :  { %v950_v27 = vpop.f32.mrf.mxu1 }
  0xc7   :  { %v868_v28 = vclamps-f32 %v950_v27, 60.0 }
  0xc8   :  { %v368_v29 = vpop.f32.mrf.mxu1 }
  0xc9   :  { %v480_v30 = vsub.f32 0.0, %v868_v28  ;;  %v528_v31 = vmul.f32 -0.2, %v868_v28  ;;  %v867_v32 = vclamps-f32 %v368_v29, 60.0 }
  0xca   :  { %v953_v33 = vpop.f32.mrf.mxu1 }
  0xcb   :  { %v497_v34 = vmul.f32 1.442695, %v480_v30  ;;  %v545_v35 = vmul.f32 1.442695, %v528_v31  ;;  %v870_v36 = vclamps-f32 %v953_v33, 60.0  ;;  %v479_v39 = vsub.f32 0.0, %v867_v32 }
  0xcc   :  { %v527_v37 = vmul.f32 -0.2, %v867_v32  ;;  %v378_v42 = vpop.f32.mrf.mxu1 }
  0xcd   :  { %975 = vpow2.f32 %v497_v34  ;;  %v530_v38 = vmul.f32 -0.2, %v870_v36  ;;  %v482_v43 = vsub.f32 0.0, %v870_v36  ;;  %v495_v44 = vmul.f32 1.442695, %v479_v39 }
  0xce   :  { %977 = vpow2.f32 %v545_v35  ;;  %v543_v40 = vmul.f32 1.442695, %v527_v37  ;;  %v869_v45 = vclamps-f32 %v378_v42, 60.0  ;;  %v956_v46 = vpop.f32.mrf.mxu1 }
  0xcf   :  { %v549_v41 = vmul.f32 1.442695, %v530_v38  ;;  %v501_v47 = vmul.f32 1.442695, %v482_v43  ;;  %v872_v51 = vclamps-f32 %v956_v46, 60.0  ;;  %v930_v46 = vpop.f32.mrf.mxu0 }
  0xd0   :  { %979 = vpow2.f32 %v543_v40  ;;  %v481_v48 = vsub.f32 0.0, %v869_v45  ;;  %v388_v49 = vpop.f32.mrf.mxu1  ;;  %v529_v50 = vmul.f32 -0.2, %v869_v45 }
  0xd1   :  { %981 = vpow2.f32 %v549_v41  ;;  %v871_v54 = vclamps-f32 %v388_v49, 60.0  ;;  %v532_v57 = vmul.f32 -0.2, %v872_v51  ;;  %v484_v62 = vsub.f32 0.0, %v872_v51 }
  0xd2   :  { %983 = vpow2.f32 %v495_v44  ;;  %v499_v53 = vmul.f32 1.442695, %v481_v48  ;;  %v547_v56 = vmul.f32 1.442695, %v529_v50  ;;  %v959_v60 = vpop.f32.mrf.mxu1 }
  0xd3   :  { %985 = vpow2.f32 %v501_v47  ;;  %v531_v58 = vmul.f32 -0.2, %v871_v54  ;;  %v553_v63 = vmul.f32 1.442695, %v532_v57  ;;  %v483_v0 = vsub.f32 0.0, %v871_v54  ;;  %v108_v54 = vpop.f32.mrf.mxu0 }
  0xd4   :  { %987 = vpow2.f32 %v499_v53  ;;  %v398_v3 = vpop.f32.mrf.mxu1  ;;  %v505_v4 = vmul.f32 1.442695, %v484_v62  ;;  %v874_v5 = vclamps-f32 %v959_v60, 60.0  ;;  %v885_v47 = vpack.c.bf16 %v930_v46, %v930_v46 }
  0xd5   :  { %989 = vpow2.f32 %v547_v56  ;;  %v551_v1 = vmul.f32 1.442695, %v531_v58  ;;  %v503_v7 = vmul.f32 1.442695, %v483_v0  ;;  %v873_v8 = vclamps-f32 %v398_v3, 60.0  ;;  %v931_v58 = vpop.f32.mrf.mxu0 }
  0xd6   :  { %991 = vpow2.f32 %v553_v63  ;;  %v534_v9 = vmul.f32 -0.2, %v874_v5  ;;  %v962_v12 = vpop.f32.mrf.mxu1  ;;  %v486_v13 = vsub.f32 0.0, %v874_v5  ;;  %238 = vst.msk [vmem:[%s1438_s3 + $0x8] sm:$0xf] %vm235_vm1, %v885_v47  ;;  %v886_v62 = vpack.c.bf16 %v931_v58, %v931_v58 }
  0xd7   :  { %993 = vpow2.f32 %v551_v1  ;;  %v533_v10 = vmul.f32 -0.2, %v873_v8  ;;  %v485_v16 = vsub.f32 0.0, %v873_v8  ;;  %v876_v20 = vclamps-f32 %v962_v12, 60.0  ;;  %v111_v0 = vpop.f32.mrf.mxu0 }
  0xd8   :  { %995 = vpow2.f32 %v505_v4  ;;  %v557_v14 = vmul.f32 1.442695, %v534_v9  ;;  %v408_v18 = vpop.f32.mrf.mxu1  ;;  %v509_v19 = vmul.f32 1.442695, %v486_v13  ;;  %239 = vst.msk [vmem:[%s1438_s3 + $0xc] sm:$0xf] %vm235_vm1, %v886_v62  ;;  %v884_v1 = vpack.c.bf16 %v111_v0, %v111_v0 }
  0xd9   :  { %997 = vpow2.f32 %v503_v7  ;;  %v555_v17 = vmul.f32 1.442695, %v533_v10  ;;  %v507_v22 = vmul.f32 1.442695, %v485_v16  ;;  %v875_v23 = vclamps-f32 %v408_v18, 60.0  ;;  %v934_v4 = vpop.f32.mrf.mxu0 }
  0xda   :  { %v1147_v52 = vpop.eup %975  ;;  %999 = vpow2.f32 %v557_v14  ;;  %v536_v25 = vmul.f32 -0.2, %v876_v20  ;;  %v965_v29 = vpop.f32.mrf.mxu1  ;;  %v488_v30 = vsub.f32 0.0, %v876_v20  ;;  %237 = vst.msk [vmem:[%s1438_s3 + $0x4] sm:$0xf] %vm235_vm1, %v884_v1  ;;  %v889_v8 = vpack.c.bf16 %v934_v4, %v934_v4 }
  0xdb   :  { %v978_v55 = vpop.eup %977  ;;  %657 = vrot.lane.b32.xlu1 %v1147_v52, %s1039_s0  ;;  %1001 = vpow2.f32 %v555_v17  ;;  %v535_v27 = vmul.f32 -0.2, %v875_v23  ;;  %v487_v32 = vsub.f32 0.0, %v875_v23  ;;  %v878_v36 = vclamps-f32 %v965_v29, 60.0  ;;  %v124_v12 = vpop.f32.mrf.mxu0 }
  0xdc   :  { %593 = vrot.lane.b32.xlu0 %v978_v55, %s1039_s0  ;;  %1003 = vpow2.f32 %v509_v19  ;;  %v561_v31 = vmul.f32 1.442695, %v536_v25  ;;  %v418_v34 = vpop.f32.mrf.mxu1  ;;  %v513_v35 = vmul.f32 1.442695, %v488_v30  ;;  %242 = vst.msk [vmem:[%s1438_s3 + $0x18] sm:$0xf] %vm235_vm1, %v889_v8  ;;  %v887_v13 = vpack.c.bf16 %v124_v12, %v124_v12 }
  0xdd   :  { %v980_v59 = vpop.eup %979  ;;  %1005 = vpow2.f32 %v507_v22  ;;  %v559_v33 = vmul.f32 1.442695, %v535_v27  ;;  %v511_v38 = vmul.f32 1.442695, %v487_v32  ;;  %v877_v39 = vclamps-f32 %v418_v34, 60.0  ;;  %v935_v16 = vpop.f32.mrf.mxu0 }
  0xde   :  { %v982_v61 = vpop.eup %981  ;;  %1007 = vpow2.f32 %v561_v31  ;;  %v538_v41 = vmul.f32 -0.2, %v878_v36  ;;  %v968_v45 = vpop.f32.mrf.mxu1  ;;  %v490_v48 = vsub.f32 0.0, %v878_v36  ;;  %240 = vst.msk [vmem:[%s1438_s3 + $0x10] sm:$0xf] %vm235_vm1, %v887_v13  ;;  %v890_v19 = vpack.c.bf16 %v935_v16, %v935_v16 }
  0xdf   :  { %705 = vrot.lane.b32.xlu1 %v978_v55, %s1040_s2  ;;  %v1154_v2 = vpop.eup %983  ;;  %1009 = vpow2.f32 %v559_v33  ;;  %v537_v43 = vmul.f32 -0.2, %v877_v39  ;;  %v489_v50 = vsub.f32 0.0, %v877_v39  ;;  %v883_v55 = vpack.c.bf16 %v108_v54, %v108_v54 }
  0xe0   :  { %591 = vrot.lane.b32.xlu0 %v980_v59, %s1039_s0  ;;  %v1159_v6 = vpop.eup %985  ;;  %1011 = vpow2.f32 %v513_v35  ;;  %v565_v49 = vmul.f32 1.442695, %v538_v41  ;;  %v428_v53 = vpop.f32.mrf.mxu1  ;;  %v517_v56 = vmul.f32 1.442695, %v490_v48  ;;  %v880_v57 = vclamps-f32 %v968_v45, 60.0 }
  0xe1   :  { %v1164_v11 = vpop.eup %987  ;;  %1013 = vpow2.f32 %v511_v38  ;;  %v563_v51 = vmul.f32 1.442695, %v537_v43  ;;  %v515_v60 = vmul.f32 1.442695, %v489_v50  ;;  %236 = vst.msk [vmem:[%s1438_s3] sm:$0xf] %vm235_vm1, %v883_v55 }
  0xe2   :  { %v990_v15 = vpop.eup %989  ;;  %1015 = vpow2.f32 %v565_v49  ;;  %v540_v3 = vmul.f32 -0.2, %v880_v57  ;;  %v971_v10 = vpop.f32.mrf.mxu1  ;;  %v492_v14 = vsub.f32 0.0, %v880_v57  ;;  %243 = vst.msk [vmem:[%s1438_s3 + $0x1c] sm:$0xf] %vm235_vm1, %v890_v19 }
  0xe3   :  { %597 = vrot.lane.b32.xlu1 %v982_v61, %s1039_s0  ;;  %v992_v21 = vpop.eup %991  ;;  %1017 = vpow2.f32 %v563_v51 }
  0xe4   :  { %655 = vrot.lane.b32.xlu0 %v1154_v2, %s1039_s0  ;;  %v994_v24 = vpop.eup %993  ;;  %1019 = vpow2.f32 %v517_v56  ;;  %v438_v20 = vpop.f32.mrf.mxu1  ;;  %v521_v23 = vmul.f32 1.442695, %v492_v14 }
  0xe5   :  { %v1173_v26 = vpop.eup %995  ;;  %1021 = vpow2.f32 %v515_v60  ;;  %v881_v30 = vclamps-f32 %v438_v20, 60.0 }
  0xe6   :  { %v1175_v28 = vpop.eup %997 }
  0xe7   :  { %661 = vrot.lane.b32.xlu1 %v1159_v6, %s1039_s0  ;;  %v1000_v37 = vpop.eup %999  ;;  %v541_v38 = vmul.f32 -0.2, %v881_v30  ;;  %v493_v48 = vsub.f32 0.0, %v881_v30 }
  0xe8   :  { %703 = vrot.lane.b32.xlu0 %v980_v59, %s1040_s2  ;;  %v1002_v40 = vpop.eup %1001 }
  0xe9   :  { %v1185_v42 = vpop.eup %1003  ;;  %v571_v49 = vmul.f32 1.442695, %v541_v38  ;;  %v523_v57 = vmul.f32 1.442695, %v493_v48 }
  0xea   :  { %v1187_v44 = vpop.eup %1005 }
  0xeb   :  { %709 = vrot.lane.b32.xlu1 %v982_v61, %s1040_s2  ;;  %v1008_v59 = vpop.eup %1007  ;;  %v879_v61 = vclamps-f32 %v428_v53, 60.0 }
  0xec   :  { %659 = vrot.lane.b32.xlu0 %v1164_v11, %s1039_s0  ;;  %v1010_v63 = vpop.eup %1009 }
  0xed   :  { %v1209_v5 = vpop.eup %1011  ;;  %v539_v7 = vmul.f32 -0.2, %v879_v61  ;;  %v491_v17 = vsub.f32 0.0, %v879_v61 }
  0xee   :  { %v1215_v9 = vpop.eup %1013 }
  0xef   :  { %595 = vrot.lane.b32.xlu1 %v990_v15, %s1039_s0  ;;  %v567_v18 = vmul.f32 1.442695, %v539_v7  ;;  %v1016_v27 = vpop.eup %1015  ;;  %v519_v29 = vmul.f32 1.442695, %v491_v17 }
  0xf0   :  { %707 = vrot.lane.b32.xlu0 %v990_v15, %s1040_s2  ;;  %v569_v15 = vmul.f32 1.442695, %v540_v3  ;;  %v1018_v32 = vpop.eup %1017 }
  0xf2   :  { %1023 = vpow2.f32 %v569_v15 }
  0xf3   :  { %601 = vrot.lane.b32.xlu1 %v992_v21, %s1039_s0  ;;  %1025 = vpow2.f32 %v567_v18 }
  0xf4   :  { %599 = vrot.lane.b32.xlu0 %v994_v24, %s1039_s0  ;;  %1027 = vpow2.f32 %v521_v23 }
  0xf5   :  { %1029 = vpow2.f32 %v519_v29 }
  0xf7   :  { %665 = vrot.lane.b32.xlu1 %v1173_v26, %s1039_s0 }
  0xf8   :  { %663 = vrot.lane.b32.xlu0 %v1175_v28, %s1039_s0 }
  0xfb   :  { %713 = vrot.lane.b32.xlu1 %v992_v21, %s1040_s2  ;;  %v127_v21 = vpop.f32.mrf.mxu0 }
  0xfc   :  { %711 = vrot.lane.b32.xlu0 %v994_v24, %s1040_s2  ;;  %v888_v22 = vpack.c.bf16 %v127_v21, %v127_v21  ;;  %v882_v24 = vclamps-f32 %v971_v10, 60.0 }
  0xfd   :  { %v938_v25 = vpop.f32.mrf.mxu0 }
  0xfe   :  { %241 = vst.msk [vmem:[%s1438_s3 + $0x14] sm:$0xf] %vm235_vm1, %v888_v22  ;;  %v893_v31 = vpack.c.bf16 %v938_v25, %v938_v25  ;;  %v542_v35 = vmul.f32 -0.2, %v882_v24  ;;  %v494_v45 = vsub.f32 0.0, %v882_v24 }
  0xff   :  { %605 = vrot.lane.b32.xlu1 %v1000_v37, %s1039_s0  ;;  %v140_v33 = vpop.f32.mrf.mxu0 }
 0x100   :  { %603 = vrot.lane.b32.xlu0 %v1002_v40, %s1039_s0  ;;  %246 = vst.msk [vmem:[%s1438_s3 + $0x28] sm:$0xf] %vm235_vm1, %v893_v31  ;;  %v891_v34 = vpack.c.bf16 %v140_v33, %v140_v33  ;;  %v573_v46 = vmul.f32 1.442695, %v542_v35  ;;  %v525_v54 = vmul.f32 1.442695, %v494_v45 }
 0x101   :  { %v939_v36 = vpop.f32.mrf.mxu0 }
 0x102   :  { %244 = vst.msk [vmem:[%s1438_s3 + $0x20] sm:$0xf] %vm235_vm1, %v891_v34  ;;  %v894_v39 = vpack.c.bf16 %v939_v36, %v939_v36  ;;  %1031 = vpow2.f32 %v573_v46 }
 0x103   :  { %669 = vrot.lane.b32.xlu1 %v1185_v42, %s1039_s0  ;;  %v143_v41 = vpop.f32.mrf.mxu0  ;;  %1033 = vpow2.f32 %v571_v49 }
 0x104   :  { %667 = vrot.lane.b32.xlu0 %v1187_v44, %s1039_s0  ;;  %247 = vst.msk [vmem:[%s1438_s3 + $0x2c] sm:$0xf] %vm235_vm1, %v894_v39  ;;  %v892_v43 = vpack.c.bf16 %v143_v41, %v143_v41  ;;  %1035 = vpow2.f32 %v525_v54 }
 0x105   :  { %v942_v47 = vpop.f32.mrf.mxu0  ;;  %1037 = vpow2.f32 %v523_v57 }
 0x106   :  { %245 = vst.msk [vmem:[%s1438_s3 + $0x24] sm:$0xf] %vm235_vm1, %v892_v43  ;;  %v897_v50 = vpack.c.bf16 %v942_v47, %v942_v47 }
 0x107   :  { %717 = vrot.lane.b32.xlu1 %v1000_v37, %s1040_s2  ;;  %v1245_v37 = vpop.eup %1019  ;;  %v156_v51 = vpop.f32.mrf.mxu0 }
 0x108   :  { %715 = vrot.lane.b32.xlu0 %v1002_v40, %s1040_s2  ;;  %v1251_v40 = vpop.eup %1021  ;;  %250 = vst.msk [vmem:[%s1438_s3 + $0x38] sm:$0xf] %vm235_vm1, %v897_v50  ;;  %v895_v53 = vpack.c.bf16 %v156_v51, %v156_v51 }
 0x109   :  { %v943_v55 = vpop.f32.mrf.mxu0  ;;  %v1024_v56 = vpop.eup %1023 }
 0x10a   :  { %248 = vst.msk [vmem:[%s1438_s3 + $0x30] sm:$0xf] %vm235_vm1, %v895_v53  ;;  %v898_v58 = vpack.c.bf16 %v943_v55, %v943_v55 }
 0x10b   :  { %609 = vrot.lane.b32.xlu1 %v1008_v59, %s1039_s0  ;;  %v159_v60 = vpop.f32.mrf.mxu0 }
 0x10c   :  { %607 = vrot.lane.b32.xlu0 %v1010_v63, %s1039_s0  ;;  %251 = vst.msk [vmem:[%s1438_s3 + $0x3c] sm:$0xf] %vm235_vm1, %v898_v58  ;;  %v896_v61 = vpack.c.bf16 %v159_v60, %v159_v60 }
 0x10e   :  { %249 = vst.msk [vmem:[%s1438_s3 + $0x34] sm:$0xf] %vm235_vm1, %v896_v61 }
 0x10f   :  { %673 = vrot.lane.b32.xlu1 %v1209_v5, %s1039_s0 }
 0x110   :  { %671 = vrot.lane.b32.xlu0 %v1215_v9, %s1039_s0 }
 0x113   :  { %721 = vrot.lane.b32.xlu1 %v1008_v59, %s1040_s2  ;;  %v1026_v59 = vpop.eup %1025 }
 0x114   :  { %719 = vrot.lane.b32.xlu0 %v1010_v63, %s1040_s2  ;;  %v1281_v62 = vpop.eup %1027 }
 0x115   :  { %v1287_v63 = vpop.eup %1029 }
 0x116   :  { %v1032_v0 = vpop.eup %1031 }
 0x117   :  { %613 = vrot.lane.b32.xlu1 %v1016_v27, %s1039_s0  ;;  %v1034_v1 = vpop.eup %1033 }
 0x118   :  { %611 = vrot.lane.b32.xlu0 %v1018_v32, %s1039_s0  ;;  %v1297_v3 = vpop.eup %1035 }
 0x119   :  { %v1299_v4 = vpop.eup %1037 }
 0x11b   :  { %677 = vrot.lane.b32.xlu1 %v1245_v37, %s1039_s0 }
 0x11c   :  { %675 = vrot.lane.b32.xlu0 %v1251_v40, %s1039_s0 }
 0x11f   :  { %725 = vrot.lane.b32.xlu1 %v1016_v27, %s1040_s2 }
 0x120   :  { %723 = vrot.lane.b32.xlu0 %v1018_v32, %s1040_s2 }
 0x123   :  { %617 = vrot.lane.b32.xlu1 %v1024_v56, %s1039_s0 }
 0x124   :  { %615 = vrot.lane.b32.xlu0 %v1026_v59, %s1039_s0 }
 0x127   :  { %681 = vrot.lane.b32.xlu1 %v1281_v62, %s1039_s0 }
 0x128   :  { %679 = vrot.lane.b32.xlu0 %v1287_v63, %s1039_s0 }
 0x12b   :  { %729 = vrot.lane.b32.xlu1 %v1024_v56, %s1040_s2 }
 0x12c   :  { %727 = vrot.lane.b32.xlu0 %v1026_v59, %s1040_s2 }
 0x12f   :  { %621 = vrot.lane.b32.xlu1 %v1032_v0, %s1039_s0 }
 0x130   :  { %619 = vrot.lane.b32.xlu0 %v1034_v1, %s1039_s0 }
 0x133   :  { %685 = vrot.lane.b32.xlu1 %v1297_v3, %s1039_s0 }
 0x134   :  { %683 = vrot.lane.b32.xlu0 %v1299_v4, %s1039_s0 }
 0x137   :  { %733 = vrot.lane.b32.xlu1 %v1032_v0, %s1040_s2 }
 0x138   :  { %731 = vrot.lane.b32.xlu0 %v1034_v1, %s1040_s2 }
 0x14d   :  { %v658_v7 = vpop.permute.xlu1 %657 }
 0x14e   :  { %v594_v8 = vpop.permute.xlu0 %593 }
 0x14f   :  { %v753_v10 = vsel %vm751_vm2, %v1147_v52, %v594_v8 }
 0x150   :  { %v769_v12 = vsel %vm49_vm0, %v753_v10, %v658_v7 }
 0x151   :  { %v706_v13 = vpop.permute.xlu1 %705 }
 0x152   :  { %v786_v14 = vsel %vm784_vm3, %v769_v12, %v706_v13  ;;  %v592_v15 = vpop.permute.xlu0 %591 }
 0x153   :  { %803 = vst.msk [vmem:[%s1439_s4 + $0x8] sm:$0xff] %vm801_vm4, %v786_v14  ;;  %v752_v18 = vsel %vm751_vm2, %v1154_v2, %v592_v15 }
 0x155   :  { %v598_v16 = vpop.permute.xlu1 %597 }
 0x156   :  { %v656_v17 = vpop.permute.xlu0 %655  ;;  %v755_v22 = vsel %vm751_vm2, %v1159_v6, %v598_v16 }
 0x157   :  { %v768_v52 = vsel %vm49_vm0, %v752_v18, %v656_v17 }
 0x159   :  { %v662_v19 = vpop.permute.xlu1 %661 }
 0x15a   :  { %v704_v20 = vpop.permute.xlu0 %703  ;;  %v771_v23 = vsel %vm49_vm0, %v755_v22, %v662_v19 }
 0x15b   :  { %v785_v21 = vsel %vm784_vm3, %v768_v52, %v704_v20 }
 0x15c   :  { %802 = vst.msk [vmem:[%s1439_s4] sm:$0xff] %vm801_vm4, %v785_v21 }
 0x15d   :  { %v710_v24 = vpop.permute.xlu1 %709 }
 0x15e   :  { %v788_v25 = vsel %vm784_vm3, %v771_v23, %v710_v24  ;;  %v660_v2 = vpop.permute.xlu0 %659 }
 0x15f   :  { %805 = vst.msk [vmem:[%s1439_s4 + $0x18] sm:$0xff] %vm801_vm4, %v788_v25 }
 0x161   :  { %v596_v27 = vpop.permute.xlu1 %595 }
 0x162   :  { %v754_v6 = vsel %vm751_vm2, %v1164_v11, %v596_v27  ;;  %v708_v29 = vpop.permute.xlu0 %707 }
 0x163   :  { %v770_v30 = vsel %vm49_vm0, %v754_v6, %v660_v2 }
 0x164   :  { %v787_v31 = vsel %vm784_vm3, %v770_v30, %v708_v29 }
 0x165   :  { %804 = vst.msk [vmem:[%s1439_s4 + $0x10] sm:$0xff] %vm801_vm4, %v787_v31  ;;  %v602_v32 = vpop.permute.xlu1 %601 }
 0x166   :  { %v600_v33 = vpop.permute.xlu0 %599  ;;  %v757_v36 = vsel %vm751_vm2, %v1173_v26, %v602_v32 }
 0x167   :  { %v756_v11 = vsel %vm751_vm2, %v1175_v28, %v600_v33 }
 0x169   :  { %v666_v34 = vpop.permute.xlu1 %665 }
 0x16a   :  { %v664_v35 = vpop.permute.xlu0 %663  ;;  %v773_v38 = vsel %vm49_vm0, %v757_v36, %v666_v34 }
 0x16b   :  { %v772_v41 = vsel %vm49_vm0, %v756_v11, %v664_v35 }
 0x16d   :  { %v714_v39 = vpop.permute.xlu1 %713 }
 0x16e   :  { %v790_v43 = vsel %vm784_vm3, %v773_v38, %v714_v39  ;;  %v712_v45 = vpop.permute.xlu0 %711 }
 0x16f   :  { %807 = vst.msk [vmem:[%s1439_s4 + $0x28] sm:$0xff] %vm801_vm4, %v790_v43  ;;  %v789_v46 = vsel %vm784_vm3, %v772_v41, %v712_v45 }
 0x170   :  { %806 = vst.msk [vmem:[%s1439_s4 + $0x20] sm:$0xff] %vm801_vm4, %v789_v46 }
 0x171   :  { %v606_v26 = vpop.permute.xlu1 %605 }
 0x172   :  { %v604_v28 = vpop.permute.xlu0 %603  ;;  %v759_v49 = vsel %vm751_vm2, %v1185_v42, %v606_v26 }
 0x173   :  { %v758_v50 = vsel %vm751_vm2, %v1187_v44, %v604_v28 }
 0x175   :  { %v670_v47 = vpop.permute.xlu1 %669 }
 0x176   :  { %v668_v48 = vpop.permute.xlu0 %667  ;;  %v775_v51 = vsel %vm49_vm0, %v759_v49, %v670_v47 }
 0x177   :  { %v774_v54 = vsel %vm49_vm0, %v758_v50, %v668_v48 }
 0x179   :  { %v718_v53 = vpop.permute.xlu1 %717 }
 0x17a   :  { %v792_v55 = vsel %vm784_vm3, %v775_v51, %v718_v53  ;;  %v716_v56 = vpop.permute.xlu0 %715 }
 0x17b   :  { %809 = vst.msk [vmem:[%s1439_s4 + $0x38] sm:$0xff] %vm801_vm4, %v792_v55  ;;  %v791_v57 = vsel %vm784_vm3, %v774_v54, %v716_v56 }
 0x17c   :  { %808 = vst.msk [vmem:[%s1439_s4 + $0x30] sm:$0xff] %vm801_vm4, %v791_v57 }
 0x17d   :  { %v610_v42 = vpop.permute.xlu1 %609 }
 0x17e   :  { %v608_v44 = vpop.permute.xlu0 %607  ;;  %v761_v60 = vsel %vm751_vm2, %v1209_v5, %v610_v42 }
 0x17f   :  { %v760_v61 = vsel %vm751_vm2, %v1215_v9, %v608_v44 }
 0x181   :  { %v674_v58 = vpop.permute.xlu1 %673 }
 0x182   :  { %v672_v59 = vpop.permute.xlu0 %671  ;;  %v777_v0 = vsel %vm49_vm0, %v761_v60, %v674_v58 }
 0x183   :  { %v776_v7 = vsel %vm49_vm0, %v760_v61, %v672_v59 }
 0x185   :  { %v722_v1 = vpop.permute.xlu1 %721 }
 0x186   :  { %v794_v8 = vsel %vm784_vm3, %v777_v0, %v722_v1  ;;  %v720_v10 = vpop.permute.xlu0 %719 }
 0x187   :  { %811 = vst.msk [vmem:[%s1439_s4 + $0x48] sm:$0xff] %vm801_vm4, %v794_v8  ;;  %v793_v12 = vsel %vm784_vm3, %v776_v7, %v720_v10 }
 0x188   :  { %810 = vst.msk [vmem:[%s1439_s4 + $0x40] sm:$0xff] %vm801_vm4, %v793_v12 }
 0x189   :  { %v614_v5 = vpop.permute.xlu1 %613 }
 0x18a   :  { %v612_v9 = vpop.permute.xlu0 %611  ;;  %v763_v15 = vsel %vm751_vm2, %v1245_v37, %v614_v5 }
 0x18b   :  { %v762_v16 = vsel %vm751_vm2, %v1251_v40, %v612_v9 }
 0x18d   :  { %v678_v13 = vpop.permute.xlu1 %677 }
 0x18e   :  { %v676_v14 = vpop.permute.xlu0 %675  ;;  %v779_v17 = vsel %vm49_vm0, %v763_v15, %v678_v13 }
 0x18f   :  { %v778_v19 = vsel %vm49_vm0, %v762_v16, %v676_v14 }
 0x191   :  { %v726_v18 = vpop.permute.xlu1 %725 }
 0x192   :  { %v796_v52 = vsel %vm784_vm3, %v779_v17, %v726_v18  ;;  %v724_v20 = vpop.permute.xlu0 %723 }
 0x193   :  { %813 = vst.msk [vmem:[%s1439_s4 + $0x58] sm:$0xff] %vm801_vm4, %v796_v52  ;;  %v795_v21 = vsel %vm784_vm3, %v778_v19, %v724_v20 }
 0x194   :  { %812 = vst.msk [vmem:[%s1439_s4 + $0x50] sm:$0xff] %vm801_vm4, %v795_v21 }
 0x195   :  { %v618_v37 = vpop.permute.xlu1 %617 }
 0x196   :  { %v616_v40 = vpop.permute.xlu0 %615  ;;  %v765_v24 = vsel %vm751_vm2, %v1281_v62, %v618_v37 }
 0x197   :  { %v764_v25 = vsel %vm751_vm2, %v1287_v63, %v616_v40 }
 0x199   :  { %v682_v22 = vpop.permute.xlu1 %681 }
 0x19a   :  { %v680_v23 = vpop.permute.xlu0 %679  ;;  %v781_v2 = vsel %vm49_vm0, %v765_v24, %v682_v22 }
 0x19b   :  { %v780_v6 = vsel %vm49_vm0, %v764_v25, %v680_v23 }
 0x19d   :  { %v730_v27 = vpop.permute.xlu1 %729 }
 0x19e   :  { %v798_v29 = vsel %vm784_vm3, %v781_v2, %v730_v27  ;;  %v728_v30 = vpop.permute.xlu0 %727 }
 0x19f   :  { %815 = vst.msk [vmem:[%s1439_s4 + $0x68] sm:$0xff] %vm801_vm4, %v798_v29  ;;  %v797_v31 = vsel %vm784_vm3, %v780_v6, %v728_v30 }
 0x1a0   :  { %814 = vst.msk [vmem:[%s1439_s4 + $0x60] sm:$0xff] %vm801_vm4, %v797_v31 }
 0x1a1   :  { %v622_v62 = vpop.permute.xlu1 %621 }
 0x1a2   :  { %v620_v63 = vpop.permute.xlu0 %619  ;;  %v767_v34 = vsel %vm751_vm2, %v1297_v3, %v622_v62 }
 0x1a3   :  { %v766_v35 = vsel %vm751_vm2, %v1299_v4, %v620_v63 }
 0x1a5   :  { %v686_v32 = vpop.permute.xlu1 %685 }
 0x1a6   :  { %v684_v33 = vpop.permute.xlu0 %683  ;;  %v783_v36 = vsel %vm49_vm0, %v767_v34, %v686_v32 }
 0x1a7   :  { %v782_v38 = vsel %vm49_vm0, %v766_v35, %v684_v33 }
 0x1a9   :  { %v734_v11 = vpop.permute.xlu1 %733 }
 0x1aa   :  { %v800_v39 = vsel %vm784_vm3, %v783_v36, %v734_v11  ;;  %v732_v41 = vpop.permute.xlu0 %731 }
 0x1ab   :  { %817 = vst.msk [vmem:[%s1439_s4 + $0x78] sm:$0xff] %vm801_vm4, %v800_v39  ;;  %v799_v43 = vsel %vm784_vm3, %v782_v38, %v732_v41 }
 0x1ac   :  { %816 = vst.msk [vmem:[%s1439_s4 + $0x70] sm:$0xff] %vm801_vm4, %v799_v43 }

</bundles_post_ra>
